<compile_context>
chip_gen: v6e
topology: v6e:2x2x1
jax: 0.10.0
libtpu: 0.0.40
codegen_flags: <defaults>
</compile_context>

<pallas_src>
import numpy as np
import jax
import jax.numpy as jnp
from jax.experimental import pallas as pl
from jax.experimental.pallas import tpu as pltpu


def _interp_matrix(in_size: int, out_size: int) -> np.ndarray:
    """1-D linear-interpolation matrix (out_size, in_size) reproducing
    PyTorch F.interpolate(mode='bilinear', align_corners=False) on one axis."""
    scale = in_size / out_size
    w = np.zeros((out_size, in_size), dtype=np.float32)
    for o in range(out_size):
        src = (o + 0.5) * scale - 0.5
        src = max(src, 0.0)                      # PyTorch clamps negative coords
        i0 = min(int(np.floor(src)), in_size - 1)
        i1 = min(i0 + 1, in_size - 1)
        lam = src - i0
        w[o, i0] += 1.0 - lam
        w[o, i1] += lam
    return w


def _upsample_kernel(x_ref, wwt_ref, whb_ref, o_ref):
    # x_ref  : (BC, H, W)        BC channel-images of the NCHW input
    # wwt_ref: (W, Wout)         column (W-axis) interp weights, pre-transposed
    # whb_ref: (BC, Hout, H)     row (H-axis) interp weights, broadcast over BC
    # o_ref  : (BC, Hout, Wout)  NCHW output block
    bc, h, w = x_ref.shape
    wout = wwt_ref.shape[1]

    # 1) Column interp as one big MXU GEMM: (BC*H, W) @ (W, Wout).
    #    Merging (BC, H) is layout-free when H is sublane-aligned (H=16 here).
    x2 = x_ref[...].reshape(bc * h, w)
    t1 = jnp.dot(x2, wwt_ref[...], preferred_element_type=jnp.float32)
    t1 = t1.reshape(bc, h, wout).astype(whb_ref.dtype)

    # 2) Row interp as a batched MXU GEMM: (Hout, H) @ (H, Wout) per image.
    #    Batched dot_general -> result (BC, Hout, Wout) with no transposes.
    out = jax.lax.dot_general(
        whb_ref[...], t1,
        dimension_numbers=(((2,), (1,)), ((0,), (0,))),
        preferred_element_type=jnp.float32)
    o_ref[...] = out.astype(o_ref.dtype)


def _tpu_vmem_and_cores():
    """Best-effort (VMEM bytes, TensorCores-per-chip) query with safe fallback."""
    vmem = 64 << 20          # conservative default: v7x per-TC VMEM
    try:
        info = pltpu.get_tpu_info()
        vmem = int(getattr(info, "vmem_capacity_bytes", vmem))
    except Exception:
        pass
    # Current generations: ~64 MiB/TC <=> v7x (2 TCs/chip); 128 MiB <=> v5e/v6e (1 TC).
    num_cores = 2 if vmem <= (96 << 20) else 1
    return vmem, num_cores


def _choose_channel_block(nc, h, w, hout, wout, io_isize, w_isize):
    """Pick BC (divisor of N*C per grid step) and a scoped-VMEM limit,
    chip-aware and accounting for double-buffered I/O blocks, weights and the
    f32 GEMM intermediates."""
    vmem_bytes, num_cores = _tpu_vmem_and_cores()
    if num_cores >= 2:            # v7x-like: 64 MiB / TC, 2 TCs
        step_budget = 16 << 20
        scoped_cap = 48 << 20
    else:                         # v5e / v6e: 128 MiB, 1 TC
        step_budget = 40 << 20
        scoped_cap = 96 << 20
    step_budget = min(step_budget, max(vmem_bytes // 4, 8 << 20))
    scoped_cap = min(scoped_cap, max(vmem_bytes - (16 << 20), 16 << 20))

    def step_bytes(bc):
        blk_in = bc * h * w * io_isize
        blk_out = bc * hout * wout * io_isize
        weights = (w * wout + bc * hout * h) * w_isize
        f32_tmp = (bc * h * wout + bc * hout * wout) * 4
        # double-buffered in/out blocks; weights counted x2 in case the
        # single-buffer request is unsupported; f32 intermediates of both GEMMs.
        return 2 * (blk_in + blk_out) + 2 * weights + f32_tmp

    divisors = [d for d in range(1, nc + 1) if nc % d == 0]
    feasible = [d for d in divisors if step_bytes(d) <= step_budget] or [1]

    if num_cores >= 2 and nc > 1:
        # keep >= 2 grid steps (one per TC), prefer an even step count
        even = [d for d in feasible if (nc // d) >= 2 and (nc // d) % 2 == 0]
        multi = [d for d in feasible if (nc // d) >= 2]
        feasible = even or multi or feasible

    bc = max(feasible)            # biggest DMAs + best MXU fill (M = bc*h)
    vmem_limit = int(min(scoped_cap, max(16 << 20, step_bytes(bc) + (4 << 20))))
    return bc, vmem_limit


def upsample_bilinear(x: jax.Array, scale: int = 2) -> jax.Array:
    """x: (N, C, H, W) -> (N, C, H*scale, W*scale), bilinear, align_corners=False."""
    N, C, H, W = x.shape
    Hout, Wout = H * scale, W * scale
    NC = N * C

    # bf16 taps are exact for scale=2 (0.25/0.75/1.0); keep weights in the
    # activation dtype to halve weight DMA bytes, accumulate in f32.
    w_dtype = jnp.bfloat16 if x.dtype == jnp.bfloat16 else jnp.float32
    io_isize = jnp.dtype(x.dtype).itemsize
    w_isize = jnp.dtype(w_dtype).itemsize

    BC, vmem_limit = _choose_channel_block(NC, H, W, Hout, Wout, io_isize, w_isize)

    wh = _interp_matrix(H, Hout)                                   # (Hout, H)
    ww = _interp_matrix(W, Wout)                                   # (Wout, W)
    wwt = jnp.asarray(ww.T, dtype=w_dtype)                         # (W, Wout)
    whb = jnp.asarray(np.broadcast_to(wh, (BC, Hout, H)), dtype=w_dtype)

    x3 = x.reshape(NC, H, W)      # free view — no transpose anywhere

    def call(single_buffer_weights):
        wkw = dict(pipeline_mode=pl.Buffered(1)) if single_buffer_weights else {}
        in_specs = [
            pl.BlockSpec((BC, H, W), lambda i: (i, 0, 0)),
            pl.BlockSpec((W, Wout), lambda i: (0, 0), **wkw),        # resident
            pl.BlockSpec((BC, Hout, H), lambda i: (0, 0, 0), **wkw),  # resident
        ]
        return pl.pallas_call(
            _upsample_kernel,
            out_shape=jax.ShapeDtypeStruct((NC, Hout, Wout), x.dtype),
            grid=(NC // BC,),
            in_specs=in_specs,
            out_specs=pl.BlockSpec((BC, Hout, Wout), lambda i: (i, 0, 0)),
            compiler_params=pltpu.CompilerParams(
                dimension_semantics=("parallel",),
                vmem_limit_bytes=vmem_limit),
        )(x3, wwt, whb)

    try:
        out3 = call(True)          # single-buffer the resident weights
    except Exception:
        out3 = call(False)         # fallback if Buffered(1) is unsupported

    return out3.reshape(N, C, Hout, Wout)    # free view — no transpose


if __name__ == "__main__":
    key = jax.random.PRNGKey(0)
    # Module spec: input_shape=(C, H, W)=(4, 16, 16) -> ndims==3 -> 'bilinear',
    # scale=2; batch 2.
    x = jax.random.normal(key, (2, 4, 16, 16), dtype=jnp.float32)

    y = upsample_bilinear(x, scale=2)
    y = jax.block_until_ready(y)

    assert y.shape == (2, 4, 32, 32), y.shape
    # jax.image.resize 'linear' uses half-pixel coords == PyTorch bilinear with
    # align_corners=False.  Tolerance absorbs TPU MXU f32 matmul pass-rounding
    # differences between the kernel GEMMs and resize's internal contractions.
    ref = jax.image.resize(x, (2, 4, 32, 32), method="linear")
    np.testing.assert_allclose(np.asarray(y), np.asarray(ref), atol=2e-3, rtol=2e-3)

    print("KERNEL_OK")
</pallas_src>

<mosaic_0001>
module attributes {stable_mosaic.version = 11 : i64} {
  func.func @_upsample_kernel(%arg0: i32, %arg1: memref<4x16x16xf32, #tpu.memory_space<vmem>>, %arg2: memref<16x32xf32, #tpu.memory_space<vmem>>, %arg3: memref<4x32x16xf32, #tpu.memory_space<vmem>>, %arg4: memref<4x32x32xf32, #tpu.memory_space<vmem>>) attributes {dimension_semantics = [#tpu.dimension_semantics<parallel>], iteration_bounds = array<i64: 2>, scalar_prefetch = 0 : i64, scratch_operands = 0 : i64, tpu.core_type = #tpu.core_type<tc>, window_params = [{transform_indices = @transform_0, window_bounds = array<i64: 4, 16, 16>}, {pipeline_mode = #tpu.pipeline_mode<synchronous>, transform_indices = @transform_1, window_bounds = array<i64: 16, 32>}, {pipeline_mode = #tpu.pipeline_mode<synchronous>, transform_indices = @transform_2, window_bounds = array<i64: 4, 32, 16>}, {transform_indices = @transform_3, window_bounds = array<i64: 4, 32, 32>}]} {
    %c0 = arith.constant 0 : index
    %c0_0 = arith.constant 0 : index
    %c0_1 = arith.constant 0 : index
    %0 = vector.load %arg1[%c0, %c0_0, %c0_1] : memref<4x16x16xf32, #tpu.memory_space<vmem>>, vector<4x16x16xf32>
    %1 = vector.shape_cast %0 : vector<4x16x16xf32> to vector<64x16xf32>
    %c0_2 = arith.constant 0 : index
    %c0_3 = arith.constant 0 : index
    %2 = vector.load %arg2[%c0_2, %c0_3] : memref<16x32xf32, #tpu.memory_space<vmem>>, vector<16x32xf32>
    %cst = arith.constant dense<0.000000e+00> : vector<64x32xf32>
    %3 = tpu.matmul %1, %2, %cst {dimension_numbers = #tpu.dot_dimension_numbers<[1], [0], [0], [1], [0, 0, 1, 1], [], []>} : vector<64x16xf32>, vector<16x32xf32>, vector<64x32xf32> -> vector<64x32xf32>
    %4 = vector.shape_cast %3 : vector<64x32xf32> to vector<4x16x32xf32>
    %c0_4 = arith.constant 0 : index
    %c0_5 = arith.constant 0 : index
    %c0_6 = arith.constant 0 : index
    %5 = vector.load %arg3[%c0_4, %c0_5, %c0_6] : memref<4x32x16xf32, #tpu.memory_space<vmem>>, vector<4x32x16xf32>
    %cst_7 = arith.constant dense<0.000000e+00> : vector<4x32x32xf32>
    %6 = tpu.matmul %5, %4, %cst_7 {dimension_numbers = #tpu.dot_dimension_numbers<[2], [1], [1], [2], [0, 0, 0, 1, 1, 2], [0], [0]>} : vector<4x32x16xf32>, vector<4x16x32xf32>, vector<4x32x32xf32> -> vector<4x32x32xf32>
    %c0_8 = arith.constant 0 : index
    %c0_9 = arith.constant 0 : index
    %c0_10 = arith.constant 0 : index
    %7 = vector.load %arg4[%c0_8, %c0_9, %c0_10] : memref<4x32x32xf32, #tpu.memory_space<vmem>>, vector<4x32x32xf32>
    tpu.vector_store %arg4[%c0_8, %c0_9, %c0_10], %6 {strides = array<i32>} : memref<4x32x32xf32, #tpu.memory_space<vmem>>, vector<4x32x32xf32>,
    return
  }
  func.func @transform_0(%arg0: i32) -> (i32, i32, i32) {
    %c0_i32 = arith.constant 0 : i32
    %c0_i32_0 = arith.constant 0 : i32
    %c0_i32_1 = arith.constant 0 : i32
    return %arg0, %c0_i32, %c0_i32_0 : i32, i32, i32
  }
  func.func @transform_1(%arg0: i32) -> (i32, i32) {
    %c0_i32 = arith.constant 0 : i32
    %c0_i32_0 = arith.constant 0 : i32
    %c0_i32_1 = arith.constant 0 : i32
    return %c0_i32, %c0_i32_0 : i32, i32
  }
  func.func @transform_2(%arg0: i32) -> (i32, i32, i32) {
    %c0_i32 = arith.constant 0 : i32
    %c0_i32_0 = arith.constant 0 : i32
    %c0_i32_1 = arith.constant 0 : i32
    %c0_i32_2 = arith.constant 0 : i32
    return %c0_i32, %c0_i32_0, %c0_i32_1 : i32, i32, i32
  }
  func.func @transform_3(%arg0: i32) -> (i32, i32, i32) {
    %c0_i32 = arith.constant 0 : i32
    %c0_i32_0 = arith.constant 0 : i32
    %c0_i32_1 = arith.constant 0 : i32
    return %arg0, %c0_i32, %c0_i32_0 : i32, i32, i32
  }
}

module attributes {stable_mosaic.version = 11 : i64} {
  func.func @_upsample_kernel(%arg0: i32, %arg1: memref<4x16x16xf32, #tpu.memory_space<vmem>>, %arg2: memref<16x32xf32, #tpu.memory_space<vmem>>, %arg3: memref<4x32x16xf32, #tpu.memory_space<vmem>>, %arg4: memref<4x32x32xf32, #tpu.memory_space<vmem>>) attributes {dimension_semantics = [#tpu.dimension_semantics<parallel>], iteration_bounds = array<i64: 2>, scalar_prefetch = 0 : i64, scratch_operands = 0 : i64, tpu.core_type = #tpu.core_type<tc>, window_params = [{transform_indices = @transform_0, window_bounds = array<i64: 4, 16, 16>}, {pipeline_mode = #tpu.pipeline_mode<synchronous>, transform_indices = @transform_1, window_bounds = array<i64: 16, 32>}, {pipeline_mode = #tpu.pipeline_mode<synchronous>, transform_indices = @transform_2, window_bounds = array<i64: 4, 32, 16>}, {transform_indices = @transform_3, window_bounds = array<i64: 4, 32, 32>}]} {
    %c0 = arith.constant 0 : index
    %c0_0 = arith.constant 0 : index
    %c0_1 = arith.constant 0 : index
    %0 = vector.load %arg1[%c0, %c0_0, %c0_1] : memref<4x16x16xf32, #tpu.memory_space<vmem>>, vector<4x16x16xf32>
    %1 = vector.shape_cast %0 : vector<4x16x16xf32> to vector<64x16xf32>
    %c0_2 = arith.constant 0 : index
    %c0_3 = arith.constant 0 : index
    %2 = vector.load %arg2[%c0_2, %c0_3] : memref<16x32xf32, #tpu.memory_space<vmem>>, vector<16x32xf32>
    %cst = arith.constant dense<0.000000e+00> : vector<64x32xf32>
    %3 = tpu.matmul %1, %2, %cst {dimension_numbers = #tpu.dot_dimension_numbers<[1], [0], [0], [1], [0, 0, 1, 1], [], []>} : vector<64x16xf32>, vector<16x32xf32>, vector<64x32xf32> -> vector<64x32xf32>
    %4 = vector.shape_cast %3 : vector<64x32xf32> to vector<4x16x32xf32>
    %c0_4 = arith.constant 0 : index
    %c0_5 = arith.constant 0 : index
    %c0_6 = arith.constant 0 : index
    %5 = vector.load %arg3[%c0_4, %c0_5, %c0_6] : memref<4x32x16xf32, #tpu.memory_space<vmem>>, vector<4x32x16xf32>
    %cst_7 = arith.constant dense<0.000000e+00> : vector<4x32x32xf32>
    %6 = tpu.matmul %5, %4, %cst_7 {dimension_numbers = #tpu.dot_dimension_numbers<[2], [1], [1], [2], [0, 0, 0, 1, 1, 2], [0], [0]>} : vector<4x32x16xf32>, vector<4x16x32xf32>, vector<4x32x32xf32> -> vector<4x32x32xf32>
    %c0_8 = arith.constant 0 : index
    %c0_9 = arith.constant 0 : index
    %c0_10 = arith.constant 0 : index
    %7 = vector.load %arg4[%c0_8, %c0_9, %c0_10] : memref<4x32x32xf32, #tpu.memory_space<vmem>>, vector<4x32x32xf32>
    tpu.vector_store %arg4[%c0_8, %c0_9, %c0_10], %6 {strides = array<i32>} : memref<4x32x32xf32, #tpu.memory_space<vmem>>, vector<4x32x32xf32>,
    return
  }
  func.func @transform_0(%arg0: i32) -> (i32, i32, i32) {
    %c0_i32 = arith.constant 0 : i32
    %c0_i32_0 = arith.constant 0 : i32
    %c0_i32_1 = arith.constant 0 : i32
    return %arg0, %c0_i32, %c0_i32_0 : i32, i32, i32
  }
  func.func @transform_1(%arg0: i32) -> (i32, i32) {
    %c0_i32 = arith.constant 0 : i32
    %c0_i32_0 = arith.constant 0 : i32
    %c0_i32_1 = arith.constant 0 : i32
    return %c0_i32, %c0_i32_0 : i32, i32
  }
  func.func @transform_2(%arg0: i32) -> (i32, i32, i32) {
    %c0_i32 = arith.constant 0 : i32
    %c0_i32_0 = arith.constant 0 : i32
    %c0_i32_1 = arith.constant 0 : i32
    %c0_i32_2 = arith.constant 0 : i32
    return %c0_i32, %c0_i32_0, %c0_i32_1 : i32, i32, i32
  }
  func.func @transform_3(%arg0: i32) -> (i32, i32, i32) {
    %c0_i32 = arith.constant 0 : i32
    %c0_i32_0 = arith.constant 0 : i32
    %c0_i32_1 = arith.constant 0 : i32
    return %arg0, %c0_i32, %c0_i32_0 : i32, i32, i32
  }
}

</mosaic_0001>

<bundles_post_ra>
// kernel: tpu_custom_call.1
= control target key start
LH: loop header
LB: loop body
LE: loop exit
PB: predicated region body
PF: predicated region fallthrough
CT: control target
= control target key end

     0   :  { %8 = vsyncpa [#allocation3], 0  ;;  %s1288_s0 = inlined_call_operand.vmem [shape: f32[8,16,16], index: 0, kind: input, shape index: {}]   ;;  %s1289_s1 = inlined_call_operand.vmem [shape: f32[16,32], index: 1, kind: input, shape index: {}]   ;;  %s1290_s2 = inlined_call_operand.vmem [shape: f32[4,32,16], index: 2, kind: input, shape index: {}]   ;;  %s1291_s3 = inlined_call_operand.hbm [shape: f32[8,32,32], index: 3, kind: output, shape index: {}]  }
   0x1   :  { %10 = vsyncpa [#allocation3 + $0x1], 0  ;;  %s1070_s12 = smov 0   ;;  %s1072_s13 = smov 0  }
   0x2   :  { %s1074_s14 = smov 0   ;;  %s1076_s15 = smov 0  }
   0x3 LB: > { %s1091_s16 = sadd.s32 4294967295, %s1045_s15   ;;  %s813_s17 = sadd.s32 4294967294, %s1045_s15   ;;  %s1045_s15 = sphi %s1076_s15, %s1297_s15   ;;  %s1041_s14 = sphi %s1074_s14, %s1296_s14   ;;  %s1037_s13 = sphi %s1072_s13, %s1295_s13   ;;  %s1033_s12 = sphi %s1070_s12, %s1294_s12  }
   0x4   : > { %s1095_s18 = sadd.s32 1, %s1045_s15   ;;  %s91_s19 = sadd.s32 1, %s1041_s14 }
   0x5   : > { %s88_s20 = ssub.s32 %s1045_s15, %s1095_s18  ;;  %p101_p0 = scmp.ne.s32.totalorder %s1041_s14, %s1037_s13 }
   0x6   : > { %p89_p1 = scmp.eq.s32.totalorder %s88_s20, 0  ;;  %p102_p2 = scmp.eq.s32.totalorder %s1091_s16, 1 }
   0x7   : > { %p107_p3 = scmp.ne.s32.totalorder %s1037_s13, %s1033_s12  ;;  %p108_p4 = scmp.eq.s32.totalorder %s813_s17, 1 }
   0x8   : > { %s1106_s21 = scalar_select %p89_p1, %s1041_s14, %s91_s19  }
   0x9   : > { %p1108_p5 = por %p102_p2, %p101_p0  ;;  %p1112_p6 = por %p108_p4, %p107_p3 }
   0xa   : > { %p816_p7 = scmp.ge.s32.totalorder %s1045_s15, 1  ;;  %p142_p8 = scmp.lt.s32.totalorder %s1045_s15, 3 }
   0xc   : > { %p143_p9 = pnand %p816_p7, %p142_p8 }
   0xd   : > { %s818_s28 = sshll.u32 (!%p143_p9), %s1091_s16, 2  ;;  %s1047_s11 = smov (!%p143_p9), [#allocation2]  }
   0xe   : > { %146 = sbr.rel (%p143_p9) target bundleno = 450 (0x1c2), region = 32  ;;  %p168_p10 = scmp.lt.s32.totalorder (!%p143_p9), %s818_s28, 7 }
   0xf   : > { %s989_s17 = sshll.u32 (!%p143_p9), %s1047_s11, 4  ;;  %s990_s17 = int_to_ptr.vmem [resolvable:$false] %s989_s17 }
  0x10   : > { %s991_s19 = scalar_lea.vmem (!%p143_p9), %s990_s17, 4096 }
  0x13   : > { %v184_v0 = vld [vmem:[%s1289_s1 + $0x8] sm:$0xff]  ;;  %v183_v1 = vld [vmem:[%s1289_s1] sm:$0xff]  ;;  %s1299_s28 = smov (!%p168_p10, %s818_s28), 7  ;;  %vm185_vm0 = vcmask 130048   ;;  %v317_v15 = vld [vmem:[%s1290_s2 + $0x10] sm:$0xff]  ;;  %vm719_vm1 = vcmask 261120  }
  0x14   : > { %888 = vmatprep.subr.mxu0 %v184_v0  ;;  %s851_s29 = sshll.u32 %s1299_s28, 4  ;;  %v315_v10 = vld [vmem:[%s1290_s2] sm:$0xff]  ;;  %v316_v14 = vld [vmem:[%s1290_s2 + $0x8] sm:$0xff]  ;;  %v318_v18 = vld [vmem:[%s1290_s2 + $0x18] sm:$0xff] }
  0x15   : > { %889 = vmatpush3.msra.mxu0 %v184_v0  ;;  %s172_s5 = scalar_lea.vmem %s1288_s0, %s851_s29  ;;  %908 = vmatprep.mubr.msk.f32.mxu1 %vm185_vm0, %v315_v10  ;;  %v323_v11 = vld [vmem:[%s1290_s2 + $0x40] sm:$0xff]  ;;  %v320_v22 = vld [vmem:[%s1290_s2 + $0x28] sm:$0xff]  ;;  %v321_v23 = vld [vmem:[%s1290_s2 + $0x30] sm:$0xff]  ;;  %s164_s29 = sand.u32 1, %s1037_s13  }
  0x16   : > { %890 = vmatprep.subr.mxu0 %v183_v1  ;;  %v175_v2 = vld [vmem:[%s172_s5] sm:$0xff]  ;;  %v176_v3 = vld [vmem:[%s172_s5 + $0x8] sm:$0xff]  ;;  %v177_v4 = vld [vmem:[%s172_s5 + $0x10] sm:$0xff]  ;;  %s817_s30 = sshll.u32 %s164_s29, 7 }
  0x17   : > { %891 = vmatpush3.msra.mxu0 %v183_v1  ;;  %892 = vmatprep.mubr.msk.f32.mxu0 %vm185_vm0, %v175_v2  ;;  %v178_v5 = vld [vmem:[%s172_s5 + $0x18] sm:$0xff]  ;;  %v179_v6 = vld [vmem:[%s172_s5 + $0x20] sm:$0xff]  ;;  %v180_v7 = vld [vmem:[%s172_s5 + $0x28] sm:$0xff]  ;;  %s1203_s4 = scalar_lea.vmem [#allocation2], %s817_s30 }
  0x18   : > { %893 = vmatmul.mubr.msk.f32.vlgmr.msra.gmra.mxu0 %vm185_vm0, %v176_v3  ;;  %v181_v8 = vld [vmem:[%s172_s5 + $0x30] sm:$0xff]  ;;  %v182_v9 = vld [vmem:[%s172_s5 + $0x38] sm:$0xff]  ;;  %v319_v19 = vld [vmem:[%s1290_s2 + $0x20] sm:$0xff]  ;;  %s853_s5 = sshll.u32 %s1091_s16, 11  ;;  %s751_s6 = sshll.u32 %s1203_s4, 4  ;;  %s1240_s6 = int_to_ptr.vmem [resolvable:$true] %s751_s6 }
  0x19   : > { %895 = vmatprep.mubr.msk.f32.mxu0 %vm185_vm0, %v177_v4  ;;  %v324_v25 = vld [vmem:[%s1290_s2 + $0x48] sm:$0xff]  ;;  %v325_v26 = vld [vmem:[%s1290_s2 + $0x50] sm:$0xff]  ;;  %v322_v28 = vld [vmem:[%s1290_s2 + $0x38] sm:$0xff]  ;;  %s1238_s9 = scalar_lea.hbm %s1291_s3, %s853_s5  ;;  %s1248_s16 = scalar_lea.sflag [#allocation3], %s164_s29 }
  0x1a   : > { %v327_v29 = vld [vmem:[%s1290_s2 + $0x60] sm:$0xff]  ;;  %v326_v30 = vld [vmem:[%s1290_s2 + $0x58] sm:$0xff]  ;;  %v328_v31 = vld [vmem:[%s1290_s2 + $0x68] sm:$0xff]  ;;  %s985_s10 = scalar_lea.vmem %s1240_s6, 2048  ;;  %p992_p0 = scmp.lt.s32.totalorder %s1240_s6, %s990_s17 }
  0x1b   : > { %v329_v32 = vld [vmem:[%s1290_s2 + $0x70] sm:$0xff]  ;;  %v330_v33 = vld [vmem:[%s1290_s2 + $0x78] sm:$0xff]  ;;  %p986_p11 = scmp.ne.s32.totalorder %s1240_s6, %s985_s10  ;;  %p993_p1 = scmp.lt.s32.totalorder %s991_s19, %s985_s10 }
  0x1c   : > { %896 = vmatmul.mubr.msk.f32.gmra.mxu0 %vm185_vm0, %v178_v5 }
  0x1d   : > { %898 = vmatprep.mubr.msk.f32.mxu0 %vm185_vm0, %v179_v6  ;;  %p987_p12 = pnand %p986_p11, %p1108_p5  ;;  %p994_p2 = por %p993_p1, %p992_p0 }
  0x1f   : > { %p988_p13 = pneg %p987_p12 }
  0x20   : > { %899 = vmatmul.mubr.msk.f32.gmra.mxu0 %vm185_vm0, %v180_v7 }
  0x21   : > { %901 = vmatprep.mubr.msk.f32.mxu0 %vm185_vm0, %v181_v8  ;;  %p995_p3 = pnand %p994_p2, %p988_p13 }
  0x24   : > { %902 = vmatmul.mubr.msk.f32.gmra.mxu0 %vm185_vm0, %v182_v9 }
  0x25   : > { %928 = vmatprep.mubr.msk.f32.mxu0 %vm185_vm0, %v323_v11 }
  0xd8   : > { %v894_v12 = vpop.f32.mrf.mxu0 }
  0xd9   : > { %904 = vmatprep.subr.mxu1 %v894_v12 }
  0xda   : > { %v276_v13 = vpop.f32.mrf.mxu0  ;;  %905 = vmatpush3.msra.mxu1 %v894_v12 }
  0xdb   : > { %906 = vmatprep.subr.mxu1 %v276_v13 }
  0xdc   : > { %v897_v16 = vpop.f32.mrf.mxu0  ;;  %907 = vmatpush3.msra.mxu1 %v276_v13 }
  0xdd   : > { %914 = vmatprep.subr.mxu1 %v897_v16  ;;  %909 = vmatmul.mubr.msk.f32.vlgmr.msra.gmra.mxu1 %vm185_vm0, %v316_v14 }
  0xde   : > { %v286_v17 = vpop.f32.mrf.mxu0  ;;  %915 = vmatpush3.msra.mxu1 %v897_v16  ;;  %911 = vmatprep.mubr.msk.f32.mxu1 %vm185_vm0, %v317_v15 }
  0xdf   : > { %916 = vmatprep.subr.mxu1 %v286_v17 }
  0xe0   : > { %v900_v20 = vpop.f32.mrf.mxu0  ;;  %917 = vmatpush3.msra.mxu1 %v286_v17 }
  0xe1   : > { %924 = vmatprep.subr.mxu0 %v900_v20  ;;  %912 = vmatmul.mubr.msk.f32.gmra.mxu1 %vm185_vm0, %v318_v18 }
  0xe2   : > { %v296_v21 = vpop.f32.mrf.mxu0  ;;  %925 = vmatpush3.msra.mxu0 %v900_v20  ;;  %918 = vmatprep.mubr.msk.f32.mxu1 %vm185_vm0, %v319_v19 }
  0xe3   : > { %926 = vmatprep.subr.mxu0 %v296_v21 }
  0xe4   : > { %927 = vmatpush3.msra.mxu0 %v296_v21  ;;  %v903_v24 = vpop.f32.mrf.mxu0 }
  0xe5   : > { %934 = vmatprep.subr.mxu1 %v903_v24  ;;  %919 = vmatmul.mubr.msk.f32.vlgmr.msra.gmra.mxu1 %vm185_vm0, %v320_v22 }
  0xe6   : > { %v306_v27 = vpop.f32.mrf.mxu0  ;;  %935 = vmatpush3.msra.mxu1 %v903_v24  ;;  %921 = vmatprep.mubr.msk.f32.mxu1 %vm185_vm0, %v321_v23 }
  0xe7   : > { %936 = vmatprep.subr.mxu1 %v306_v27  ;;  %929 = vmatmul.mubr.msk.f32.vlgmr.msra.gmra.mxu0 %vm185_vm0, %v324_v25 }
  0xe8   : > { %937 = vmatpush3.msra.mxu1 %v306_v27  ;;  %931 = vmatprep.mubr.msk.f32.mxu0 %vm185_vm0, %v325_v26 }
  0xe9   : > { %922 = vmatmul.mubr.msk.f32.gmra.mxu1 %vm185_vm0, %v322_v28 }
  0xea   : > { %938 = vmatprep.mubr.msk.f32.mxu1 %vm185_vm0, %v327_v29 }
  0xeb   : > { %932 = vmatmul.mubr.msk.f32.gmra.mxu0 %vm185_vm0, %v326_v30 }
  0xed   : > { %939 = vmatmul.mubr.msk.f32.vlgmr.msra.gmra.mxu1 %vm185_vm0, %v328_v31 }
  0xee   : > { %941 = vmatprep.mubr.msk.f32.mxu1 %vm185_vm0, %v329_v32 }
  0xf1   : > { %942 = vmatmul.mubr.msk.f32.gmra.mxu1 %vm185_vm0, %v330_v33 }
 0x19d   : > { %v910_v34 = vpop.f32.mrf.mxu1 }
 0x19e   : > { %721 = vst.msk [vmem:[%s1203_s4 + $0x8] sm:$0xff] %vm719_vm1, %v910_v34 }
 0x19f   : > { %v409_v35 = vpop.f32.mrf.mxu1 }
 0x1a0   : > { %720 = vst.msk [vmem:[%s1203_s4] sm:$0xff] %vm719_vm1, %v409_v35 }
 0x1a1   : > { %v913_v36 = vpop.f32.mrf.mxu1 }
 0x1a2   : > { %723 = vst.msk [vmem:[%s1203_s4 + $0x18] sm:$0xff] %vm719_vm1, %v913_v36 }
 0x1a3   : > { %v419_v37 = vpop.f32.mrf.mxu1 }
 0x1a4   : > { %722 = vst.msk [vmem:[%s1203_s4 + $0x10] sm:$0xff] %vm719_vm1, %v419_v37 }
 0x1a5   : > { %v920_v38 = vpop.f32.mrf.mxu1 }
 0x1a6   : > { %725 = vst.msk [vmem:[%s1203_s4 + $0x28] sm:$0xff] %vm719_vm1, %v920_v38 }
 0x1a7   : > { %v506_v39 = vpop.f32.mrf.mxu1  ;;  %v930_v40 = vpop.f32.mrf.mxu0 }
 0x1a8   : > { %724 = vst.msk [vmem:[%s1203_s4 + $0x20] sm:$0xff] %vm719_vm1, %v506_v39  ;;  %729 = vst.msk [vmem:[%s1203_s4 + $0x48] sm:$0xff] %vm719_vm1, %v930_v40 }
 0x1a9   : > { %v923_v41 = vpop.f32.mrf.mxu1  ;;  %v603_v42 = vpop.f32.mrf.mxu0 }
 0x1aa   : > { %727 = vst.msk [vmem:[%s1203_s4 + $0x38] sm:$0xff] %vm719_vm1, %v923_v41  ;;  %728 = vst.msk [vmem:[%s1203_s4 + $0x40] sm:$0xff] %vm719_vm1, %v603_v42 }
 0x1ab   : > { %v516_v43 = vpop.f32.mrf.mxu1  ;;  %v933_v44 = vpop.f32.mrf.mxu0 }
 0x1ac   : > { %726 = vst.msk [vmem:[%s1203_s4 + $0x30] sm:$0xff] %vm719_vm1, %v516_v43  ;;  %731 = vst.msk [vmem:[%s1203_s4 + $0x58] sm:$0xff] %vm719_vm1, %v933_v44 }
 0x1ad   : > { %v940_v45 = vpop.f32.mrf.mxu1  ;;  %v613_v46 = vpop.f32.mrf.mxu0 }
 0x1ae   : > { %733 = vst.msk [vmem:[%s1203_s4 + $0x68] sm:$0xff] %vm719_vm1, %v940_v45  ;;  %730 = vst.msk [vmem:[%s1203_s4 + $0x50] sm:$0xff] %vm719_vm1, %v613_v46 }
 0x1af   : > { %v700_v47 = vpop.f32.mrf.mxu1 }
 0x1b0   : > { %732 = vst.msk [vmem:[%s1203_s4 + $0x60] sm:$0xff] %vm719_vm1, %v700_v47 }
 0x1b1   : > { %v943_v48 = vpop.f32.mrf.mxu1 }
 0x1b2   : > { %735 = vst.msk [vmem:[%s1203_s4 + $0x78] sm:$0xff] %vm719_vm1, %v943_v48 }
 0x1b3   : > { %v710_v49 = vpop.f32.mrf.mxu1 }
 0x1b4   : > { %734 = vst.msk [vmem:[%s1203_s4 + $0x70] sm:$0xff] %vm719_vm1, %v710_v49 }
 0x1b5   : > { %998 = shalt.err (!%p995_p3)
}
 0x1b6   : > { %s999_s20 = scalar_lea.hbm %s1238_s9, 2048  ;;  %s1003_s26 = scalar_lea.hbm %s1291_s3, 4096 }
 0x1b7   : > { %p1000_p4 = scmp.ne.s32.totalorder %s1238_s9, %s999_s20  ;;  %p1004_p9 = scmp.lt.s32.totalorder %s1238_s9, %s1291_s3 }
 0x1b8   : > { %p1005_p10 = scmp.lt.s32.totalorder %s1003_s26, %s999_s20 }
 0x1b9   : > { %p1001_p7 = pnand %p1000_p4, %p1108_p5 }
 0x1ba   : > { %p1006_p11 = por %p1005_p10, %p1004_p9 }
 0x1bb   : > { %p1002_p8 = pneg %p1001_p7 }
 0x1bd   : > { %p1007_p12 = pnand %p1006_p11, %p1002_p8 }
 0x1bf   : > { %1010 = shalt.err (!%p1007_p12)
}
 0x1c0   : > { %s1048_s29 = smov 128   ;;  %s1049_s30 = smov 8  }
 0x1c1   : > { %944 = dma.vmem_to_hbm [thread:$0]  (%p1108_p5), %s1240_s6, 2048, %s1238_s9, %s1248_s16, %s1048_s29, %s1048_s29, %s1049_s30  }
 0x1c2 PF: > { %p950_p13 = scmp.ge.s32.totalorder %s1045_s15, 2  ;;  %s766_s4 = sand.u32 1, %s1033_s12  }
 0x1c3   : > { %s767_s5 = scalar_lea.sflag [#allocation3], %s766_s4 }
 0x1c4   : > { %p947_p0 = pnand %p950_p13, %p1112_p6 }
 0x1c6   : > { %p948_p1 = pneg %p947_p0 }
 0x1c8   : > { %1028 = dma.done.wait (%p948_p1), %s767_s5, 2048  }
 0x1c9   : > { %1030 = vsyncadd (%p948_p1), %s767_s5, 4294965248  ;;  %p13_p2 = scmp.ge.s32.totalorder %s1095_s18, 4   ;;  %s1294_s12 = smov %s1037_s13 }
 0x1ca   : > { %s1295_s13 = smov %s1041_s14  ;;  %s1296_s14 = smov %s1106_s21 }
 0x1cb   : > { %s1297_s15 = smov %s1095_s18  ;;  %15 = sbr.rel (!%p13_p2) target bundleno = 3 (0x3), region = 67 }
 0x1d0   :  { %772 = vsyncpa [#allocation3], 1 }
 0x1d1   :  { %774 = vsyncpa [#allocation3 + $0x1], 1 }

// kernel: tpu_custom_call.1
= control target key start
LH: loop header
LB: loop body
LE: loop exit
PB: predicated region body
PF: predicated region fallthrough
CT: control target
= control target key end

     0   :  { %8 = vsyncpa [#allocation3], 0  ;;  %s1288_s0 = inlined_call_operand.vmem [shape: f32[8,16,16], index: 0, kind: input, shape index: {}]   ;;  %s1289_s1 = inlined_call_operand.vmem [shape: f32[16,32], index: 1, kind: input, shape index: {}]   ;;  %s1290_s2 = inlined_call_operand.vmem [shape: f32[4,32,16], index: 2, kind: input, shape index: {}]   ;;  %s1291_s3 = inlined_call_operand.hbm [shape: f32[8,32,32], index: 3, kind: output, shape index: {}]  }
   0x1   :  { %10 = vsyncpa [#allocation3 + $0x1], 0  ;;  %s1070_s12 = smov 0   ;;  %s1072_s13 = smov 0  }
   0x2   :  { %s1074_s14 = smov 0   ;;  %s1076_s15 = smov 0  }
   0x3 LB: > { %s1091_s16 = sadd.s32 4294967295, %s1045_s15   ;;  %s813_s17 = sadd.s32 4294967294, %s1045_s15   ;;  %s1045_s15 = sphi %s1076_s15, %s1297_s15   ;;  %s1041_s14 = sphi %s1074_s14, %s1296_s14   ;;  %s1037_s13 = sphi %s1072_s13, %s1295_s13   ;;  %s1033_s12 = sphi %s1070_s12, %s1294_s12  }
   0x4   : > { %s1095_s18 = sadd.s32 1, %s1045_s15   ;;  %s91_s19 = sadd.s32 1, %s1041_s14 }
   0x5   : > { %s88_s20 = ssub.s32 %s1045_s15, %s1095_s18  ;;  %p101_p0 = scmp.ne.s32.totalorder %s1041_s14, %s1037_s13 }
   0x6   : > { %p89_p1 = scmp.eq.s32.totalorder %s88_s20, 0  ;;  %p102_p2 = scmp.eq.s32.totalorder %s1091_s16, 1 }
   0x7   : > { %p107_p3 = scmp.ne.s32.totalorder %s1037_s13, %s1033_s12  ;;  %p108_p4 = scmp.eq.s32.totalorder %s813_s17, 1 }
   0x8   : > { %s1106_s21 = scalar_select %p89_p1, %s1041_s14, %s91_s19  }
   0x9   : > { %p1108_p5 = por %p102_p2, %p101_p0  ;;  %p1112_p6 = por %p108_p4, %p107_p3 }
   0xa   : > { %p816_p7 = scmp.ge.s32.totalorder %s1045_s15, 1  ;;  %p142_p8 = scmp.lt.s32.totalorder %s1045_s15, 3 }
   0xc   : > { %p143_p9 = pnand %p816_p7, %p142_p8 }
   0xd   : > { %s818_s28 = sshll.u32 (!%p143_p9), %s1091_s16, 2  ;;  %s1047_s11 = smov (!%p143_p9), [#allocation2]  }
   0xe   : > { %146 = sbr.rel (%p143_p9) target bundleno = 450 (0x1c2), region = 32  ;;  %p168_p10 = scmp.lt.s32.totalorder (!%p143_p9), %s818_s28, 7 }
   0xf   : > { %s989_s17 = sshll.u32 (!%p143_p9), %s1047_s11, 4  ;;  %s990_s17 = int_to_ptr.vmem [resolvable:$false] %s989_s17 }
  0x10   : > { %s991_s19 = scalar_lea.vmem (!%p143_p9), %s990_s17, 4096 }
  0x13   : > { %v184_v0 = vld [vmem:[%s1289_s1 + $0x8] sm:$0xff]  ;;  %v183_v1 = vld [vmem:[%s1289_s1] sm:$0xff]  ;;  %s1299_s28 = smov (!%p168_p10, %s818_s28), 7  ;;  %vm185_vm0 = vcmask 130048   ;;  %v317_v15 = vld [vmem:[%s1290_s2 + $0x10] sm:$0xff]  ;;  %vm719_vm1 = vcmask 261120  }
  0x14   : > { %888 = vmatprep.subr.mxu0 %v184_v0  ;;  %s851_s29 = sshll.u32 %s1299_s28, 4  ;;  %v315_v10 = vld [vmem:[%s1290_s2] sm:$0xff]  ;;  %v316_v14 = vld [vmem:[%s1290_s2 + $0x8] sm:$0xff]  ;;  %v318_v18 = vld [vmem:[%s1290_s2 + $0x18] sm:$0xff] }
  0x15   : > { %889 = vmatpush3.msra.mxu0 %v184_v0  ;;  %s172_s5 = scalar_lea.vmem %s1288_s0, %s851_s29  ;;  %908 = vmatprep.mubr.msk.f32.mxu1 %vm185_vm0, %v315_v10  ;;  %v323_v11 = vld [vmem:[%s1290_s2 + $0x40] sm:$0xff]  ;;  %v320_v22 = vld [vmem:[%s1290_s2 + $0x28] sm:$0xff]  ;;  %v321_v23 = vld [vmem:[%s1290_s2 + $0x30] sm:$0xff]  ;;  %s164_s29 = sand.u32 1, %s1037_s13  }
  0x16   : > { %890 = vmatprep.subr.mxu0 %v183_v1  ;;  %v175_v2 = vld [vmem:[%s172_s5] sm:$0xff]  ;;  %v176_v3 = vld [vmem:[%s172_s5 + $0x8] sm:$0xff]  ;;  %v177_v4 = vld [vmem:[%s172_s5 + $0x10] sm:$0xff]  ;;  %s817_s30 = sshll.u32 %s164_s29, 7 }
  0x17   : > { %891 = vmatpush3.msra.mxu0 %v183_v1  ;;  %892 = vmatprep.mubr.msk.f32.mxu0 %vm185_vm0, %v175_v2  ;;  %v178_v5 = vld [vmem:[%s172_s5 + $0x18] sm:$0xff]  ;;  %v179_v6 = vld [vmem:[%s172_s5 + $0x20] sm:$0xff]  ;;  %v180_v7 = vld [vmem:[%s172_s5 + $0x28] sm:$0xff]  ;;  %s1203_s4 = scalar_lea.vmem [#allocation2], %s817_s30 }
  0x18   : > { %893 = vmatmul.mubr.msk.f32.vlgmr.msra.gmra.mxu0 %vm185_vm0, %v176_v3  ;;  %v181_v8 = vld [vmem:[%s172_s5 + $0x30] sm:$0xff]  ;;  %v182_v9 = vld [vmem:[%s172_s5 + $0x38] sm:$0xff]  ;;  %v319_v19 = vld [vmem:[%s1290_s2 + $0x20] sm:$0xff]  ;;  %s853_s5 = sshll.u32 %s1091_s16, 11  ;;  %s751_s6 = sshll.u32 %s1203_s4, 4  ;;  %s1240_s6 = int_to_ptr.vmem [resolvable:$true] %s751_s6 }
  0x19   : > { %895 = vmatprep.mubr.msk.f32.mxu0 %vm185_vm0, %v177_v4  ;;  %v324_v25 = vld [vmem:[%s1290_s2 + $0x48] sm:$0xff]  ;;  %v325_v26 = vld [vmem:[%s1290_s2 + $0x50] sm:$0xff]  ;;  %v322_v28 = vld [vmem:[%s1290_s2 + $0x38] sm:$0xff]  ;;  %s1238_s9 = scalar_lea.hbm %s1291_s3, %s853_s5  ;;  %s1248_s16 = scalar_lea.sflag [#allocation3], %s164_s29 }
  0x1a   : > { %v327_v29 = vld [vmem:[%s1290_s2 + $0x60] sm:$0xff]  ;;  %v326_v30 = vld [vmem:[%s1290_s2 + $0x58] sm:$0xff]  ;;  %v328_v31 = vld [vmem:[%s1290_s2 + $0x68] sm:$0xff]  ;;  %s985_s10 = scalar_lea.vmem %s1240_s6, 2048  ;;  %p992_p0 = scmp.lt.s32.totalorder %s1240_s6, %s990_s17 }
  0x1b   : > { %v329_v32 = vld [vmem:[%s1290_s2 + $0x70] sm:$0xff]  ;;  %v330_v33 = vld [vmem:[%s1290_s2 + $0x78] sm:$0xff]  ;;  %p986_p11 = scmp.ne.s32.totalorder %s1240_s6, %s985_s10  ;;  %p993_p1 = scmp.lt.s32.totalorder %s991_s19, %s985_s10 }
  0x1c   : > { %896 = vmatmul.mubr.msk.f32.gmra.mxu0 %vm185_vm0, %v178_v5 }
  0x1d   : > { %898 = vmatprep.mubr.msk.f32.mxu0 %vm185_vm0, %v179_v6  ;;  %p987_p12 = pnand %p986_p11, %p1108_p5  ;;  %p994_p2 = por %p993_p1, %p992_p0 }
  0x1f   : > { %p988_p13 = pneg %p987_p12 }
  0x20   : > { %899 = vmatmul.mubr.msk.f32.gmra.mxu0 %vm185_vm0, %v180_v7 }
  0x21   : > { %901 = vmatprep.mubr.msk.f32.mxu0 %vm185_vm0, %v181_v8  ;;  %p995_p3 = pnand %p994_p2, %p988_p13 }
  0x24   : > { %902 = vmatmul.mubr.msk.f32.gmra.mxu0 %vm185_vm0, %v182_v9 }
  0x25   : > { %928 = vmatprep.mubr.msk.f32.mxu0 %vm185_vm0, %v323_v11 }
  0xd8   : > { %v894_v12 = vpop.f32.mrf.mxu0 }
  0xd9   : > { %904 = vmatprep.subr.mxu1 %v894_v12 }
  0xda   : > { %v276_v13 = vpop.f32.mrf.mxu0  ;;  %905 = vmatpush3.msra.mxu1 %v894_v12 }
  0xdb   : > { %906 = vmatprep.subr.mxu1 %v276_v13 }
  0xdc   : > { %v897_v16 = vpop.f32.mrf.mxu0  ;;  %907 = vmatpush3.msra.mxu1 %v276_v13 }
  0xdd   : > { %914 = vmatprep.subr.mxu1 %v897_v16  ;;  %909 = vmatmul.mubr.msk.f32.vlgmr.msra.gmra.mxu1 %vm185_vm0, %v316_v14 }
  0xde   : > { %v286_v17 = vpop.f32.mrf.mxu0  ;;  %915 = vmatpush3.msra.mxu1 %v897_v16  ;;  %911 = vmatprep.mubr.msk.f32.mxu1 %vm185_vm0, %v317_v15 }
  0xdf   : > { %916 = vmatprep.subr.mxu1 %v286_v17 }
  0xe0   : > { %v900_v20 = vpop.f32.mrf.mxu0  ;;  %917 = vmatpush3.msra.mxu1 %v286_v17 }
  0xe1   : > { %924 = vmatprep.subr.mxu0 %v900_v20  ;;  %912 = vmatmul.mubr.msk.f32.gmra.mxu1 %vm185_vm0, %v318_v18 }
  0xe2   : > { %v296_v21 = vpop.f32.mrf.mxu0  ;;  %925 = vmatpush3.msra.mxu0 %v900_v20  ;;  %918 = vmatprep.mubr.msk.f32.mxu1 %vm185_vm0, %v319_v19 }
  0xe3   : > { %926 = vmatprep.subr.mxu0 %v296_v21 }
  0xe4   : > { %927 = vmatpush3.msra.mxu0 %v296_v21  ;;  %v903_v24 = vpop.f32.mrf.mxu0 }
  0xe5   : > { %934 = vmatprep.subr.mxu1 %v903_v24  ;;  %919 = vmatmul.mubr.msk.f32.vlgmr.msra.gmra.mxu1 %vm185_vm0, %v320_v22 }
  0xe6   : > { %v306_v27 = vpop.f32.mrf.mxu0  ;;  %935 = vmatpush3.msra.mxu1 %v903_v24  ;;  %921 = vmatprep.mubr.msk.f32.mxu1 %vm185_vm0, %v321_v23 }
  0xe7   : > { %936 = vmatprep.subr.mxu1 %v306_v27  ;;  %929 = vmatmul.mubr.msk.f32.vlgmr.msra.gmra.mxu0 %vm185_vm0, %v324_v25 }
  0xe8   : > { %937 = vmatpush3.msra.mxu1 %v306_v27  ;;  %931 = vmatprep.mubr.msk.f32.mxu0 %vm185_vm0, %v325_v26 }
  0xe9   : > { %922 = vmatmul.mubr.msk.f32.gmra.mxu1 %vm185_vm0, %v322_v28 }
  0xea   : > { %938 = vmatprep.mubr.msk.f32.mxu1 %vm185_vm0, %v327_v29 }
  0xeb   : > { %932 = vmatmul.mubr.msk.f32.gmra.mxu0 %vm185_vm0, %v326_v30 }
  0xed   : > { %939 = vmatmul.mubr.msk.f32.vlgmr.msra.gmra.mxu1 %vm185_vm0, %v328_v31 }
  0xee   : > { %941 = vmatprep.mubr.msk.f32.mxu1 %vm185_vm0, %v329_v32 }
  0xf1   : > { %942 = vmatmul.mubr.msk.f32.gmra.mxu1 %vm185_vm0, %v330_v33 }
 0x19d   : > { %v910_v34 = vpop.f32.mrf.mxu1 }
 0x19e   : > { %721 = vst.msk [vmem:[%s1203_s4 + $0x8] sm:$0xff] %vm719_vm1, %v910_v34 }
 0x19f   : > { %v409_v35 = vpop.f32.mrf.mxu1 }
 0x1a0   : > { %720 = vst.msk [vmem:[%s1203_s4] sm:$0xff] %vm719_vm1, %v409_v35 }
 0x1a1   : > { %v913_v36 = vpop.f32.mrf.mxu1 }
 0x1a2   : > { %723 = vst.msk [vmem:[%s1203_s4 + $0x18] sm:$0xff] %vm719_vm1, %v913_v36 }
 0x1a3   : > { %v419_v37 = vpop.f32.mrf.mxu1 }
 0x1a4   : > { %722 = vst.msk [vmem:[%s1203_s4 + $0x10] sm:$0xff] %vm719_vm1, %v419_v37 }
 0x1a5   : > { %v920_v38 = vpop.f32.mrf.mxu1 }
 0x1a6   : > { %725 = vst.msk [vmem:[%s1203_s4 + $0x28] sm:$0xff] %vm719_vm1, %v920_v38 }
 0x1a7   : > { %v506_v39 = vpop.f32.mrf.mxu1  ;;  %v930_v40 = vpop.f32.mrf.mxu0 }
 0x1a8   : > { %724 = vst.msk [vmem:[%s1203_s4 + $0x20] sm:$0xff] %vm719_vm1, %v506_v39  ;;  %729 = vst.msk [vmem:[%s1203_s4 + $0x48] sm:$0xff] %vm719_vm1, %v930_v40 }
 0x1a9   : > { %v923_v41 = vpop.f32.mrf.mxu1  ;;  %v603_v42 = vpop.f32.mrf.mxu0 }
 0x1aa   : > { %727 = vst.msk [vmem:[%s1203_s4 + $0x38] sm:$0xff] %vm719_vm1, %v923_v41  ;;  %728 = vst.msk [vmem:[%s1203_s4 + $0x40] sm:$0xff] %vm719_vm1, %v603_v42 }
 0x1ab   : > { %v516_v43 = vpop.f32.mrf.mxu1  ;;  %v933_v44 = vpop.f32.mrf.mxu0 }
 0x1ac   : > { %726 = vst.msk [vmem:[%s1203_s4 + $0x30] sm:$0xff] %vm719_vm1, %v516_v43  ;;  %731 = vst.msk [vmem:[%s1203_s4 + $0x58] sm:$0xff] %vm719_vm1, %v933_v44 }
 0x1ad   : > { %v940_v45 = vpop.f32.mrf.mxu1  ;;  %v613_v46 = vpop.f32.mrf.mxu0 }
 0x1ae   : > { %733 = vst.msk [vmem:[%s1203_s4 + $0x68] sm:$0xff] %vm719_vm1, %v940_v45  ;;  %730 = vst.msk [vmem:[%s1203_s4 + $0x50] sm:$0xff] %vm719_vm1, %v613_v46 }
 0x1af   : > { %v700_v47 = vpop.f32.mrf.mxu1 }
 0x1b0   : > { %732 = vst.msk [vmem:[%s1203_s4 + $0x60] sm:$0xff] %vm719_vm1, %v700_v47 }
 0x1b1   : > { %v943_v48 = vpop.f32.mrf.mxu1 }
 0x1b2   : > { %735 = vst.msk [vmem:[%s1203_s4 + $0x78] sm:$0xff] %vm719_vm1, %v943_v48 }
 0x1b3   : > { %v710_v49 = vpop.f32.mrf.mxu1 }
 0x1b4   : > { %734 = vst.msk [vmem:[%s1203_s4 + $0x70] sm:$0xff] %vm719_vm1, %v710_v49 }
 0x1b5   : > { %998 = shalt.err (!%p995_p3)
}
 0x1b6   : > { %s999_s20 = scalar_lea.hbm %s1238_s9, 2048  ;;  %s1003_s26 = scalar_lea.hbm %s1291_s3, 4096 }
 0x1b7   : > { %p1000_p4 = scmp.ne.s32.totalorder %s1238_s9, %s999_s20  ;;  %p1004_p9 = scmp.lt.s32.totalorder %s1238_s9, %s1291_s3 }
 0x1b8   : > { %p1005_p10 = scmp.lt.s32.totalorder %s1003_s26, %s999_s20 }
 0x1b9   : > { %p1001_p7 = pnand %p1000_p4, %p1108_p5 }
 0x1ba   : > { %p1006_p11 = por %p1005_p10, %p1004_p9 }
 0x1bb   : > { %p1002_p8 = pneg %p1001_p7 }
 0x1bd   : > { %p1007_p12 = pnand %p1006_p11, %p1002_p8 }
 0x1bf   : > { %1010 = shalt.err (!%p1007_p12)
}
 0x1c0   : > { %s1048_s29 = smov 128   ;;  %s1049_s30 = smov 8  }
 0x1c1   : > { %944 = dma.vmem_to_hbm [thread:$0]  (%p1108_p5), %s1240_s6, 2048, %s1238_s9, %s1248_s16, %s1048_s29, %s1048_s29, %s1049_s30  }
 0x1c2 PF: > { %p950_p13 = scmp.ge.s32.totalorder %s1045_s15, 2  ;;  %s766_s4 = sand.u32 1, %s1033_s12  }
 0x1c3   : > { %s767_s5 = scalar_lea.sflag [#allocation3], %s766_s4 }
 0x1c4   : > { %p947_p0 = pnand %p950_p13, %p1112_p6 }
 0x1c6   : > { %p948_p1 = pneg %p947_p0 }
 0x1c8   : > { %1028 = dma.done.wait (%p948_p1), %s767_s5, 2048  }
 0x1c9   : > { %1030 = vsyncadd (%p948_p1), %s767_s5, 4294965248  ;;  %p13_p2 = scmp.ge.s32.totalorder %s1095_s18, 4   ;;  %s1294_s12 = smov %s1037_s13 }
 0x1ca   : > { %s1295_s13 = smov %s1041_s14  ;;  %s1296_s14 = smov %s1106_s21 }
 0x1cb   : > { %s1297_s15 = smov %s1095_s18  ;;  %15 = sbr.rel (!%p13_p2) target bundleno = 3 (0x3), region = 67 }
 0x1d0   :  { %772 = vsyncpa [#allocation3], 1 }
 0x1d1   :  { %774 = vsyncpa [#allocation3 + $0x1], 1 }

</bundles_post_ra>
